<compile_context>
chip_gen: v6e
topology: v6e:2x2x1
jax: 0.10.0
libtpu: 0.0.40
codegen_flags: <defaults>
</compile_context>

<pallas_src>
import numpy as np
import jax
import jax.numpy as jnp
from jax.experimental import pallas as pl
from jax.experimental.pallas import tpu as pltpu


# ---------------------------------------------------------------------------
# Path 1 (default): zero-copy identity via input/output aliasing.
# ---------------------------------------------------------------------------
def _noop_alias_kernel(x_hbm_ref, o_hbm_ref):
    # Output buffer is aliased to the input buffer: nothing to move or compute.
    del x_hbm_ref, o_hbm_ref


def noop_forward(x: jax.Array) -> jax.Array:
    """Identity forward (PyTorch NoOp): zero-copy via input_output_aliases.

    Call under jax.jit(noop_forward, donate_argnums=0) so XLA truly aliases
    the buffers; without donation XLA inserts a defensive copy (still correct,
    just not zero-copy).
    """
    return pl.pallas_call(
        _noop_alias_kernel,
        out_shape=jax.ShapeDtypeStruct(x.shape, x.dtype),
        in_specs=[pl.BlockSpec(memory_space=pl.ANY)],   # raw HBM ref, no auto-DMA
        out_specs=pl.BlockSpec(memory_space=pl.ANY),    # raw HBM ref (aliased to input)
        input_output_aliases={0: 0},
        cost_estimate=pl.CostEstimate(flops=0, transcendentals=0, bytes_accessed=0),
    )(x)


# ---------------------------------------------------------------------------
# Path 2: value-semantics identity (no donation required) — one HBM->HBM DMA.
# ---------------------------------------------------------------------------
def _noop_copy_kernel(x_hbm_ref, o_hbm_ref, sem):
    # Single full-array HBM -> HBM DMA: the entire "forward pass" of NoOp.
    copy = pltpu.make_async_copy(x_hbm_ref, o_hbm_ref, sem)
    copy.start()
    copy.wait()
    # TODO(synk): for tens-of-MiB+ inputs, split into 2-4 chunked DMAs
    # (SemaphoreType.DMA((N,)), start all then wait all) to hide per-descriptor
    # startup latency; one descriptor is optimal at small sizes like this test.


def noop_forward_copy(x: jax.Array) -> jax.Array:
    """Identity with fresh-buffer value semantics (caller keeps the input)."""
    nbytes = x.size * x.dtype.itemsize
    return pl.pallas_call(
        _noop_copy_kernel,
        out_shape=jax.ShapeDtypeStruct(x.shape, x.dtype),
        in_specs=[pl.BlockSpec(memory_space=pl.ANY)],   # raw HBM ref
        out_specs=pl.BlockSpec(memory_space=pl.ANY),    # raw HBM ref, we DMA into it
        scratch_shapes=[pltpu.SemaphoreType.DMA(())],   # shaped (stable) spelling
        cost_estimate=pl.CostEstimate(
            flops=0, transcendentals=0, bytes_accessed=2 * nbytes),
    )(x)


if __name__ == "__main__":
    key = jax.random.PRNGKey(0)
    # NCHW, small shape consistent with the module: batch=2, channels=4, 16x16.
    x = jax.random.normal(key, (2, 4, 16, 16), dtype=jnp.float32)
    x_host = np.asarray(x)  # host reference copy (x gets donated below)

    # --- value-semantics copy path (input stays valid) ---
    y_copy = jax.jit(noop_forward_copy)(x)
    jax.block_until_ready(y_copy)
    assert y_copy.shape == x.shape and y_copy.dtype == x.dtype
    assert np.array_equal(np.asarray(y_copy), x_host)

    # --- zero-copy aliased path (input donated; default per perf review) ---
    y = jax.jit(noop_forward, donate_argnums=0)(x)
    jax.block_until_ready(y)
    assert y.shape == x_host.shape and y.dtype == x_host.dtype
    assert np.array_equal(np.asarray(y), x_host)

    print("KERNEL_OK")
</pallas_src>

<mosaic_0001>
module attributes {stable_mosaic.version = 11 : i64} {
  func.func @_noop_copy_kernel(%arg0: memref<2x4x16x16xf32, #tpu.memory_space<any>>, %arg1: memref<2x4x16x16xf32, #tpu.memory_space<any>>, %arg2: memref<!tpu.dma_semaphore, #tpu.memory_space<semaphore_mem>>) attributes {dimension_semantics = [], scalar_prefetch = 0 : i64, scratch_operands = 1 : i64, tpu.core_type = #tpu.core_type<tc>} {
    tpu.enqueue_dma source(%arg0 : memref<2x4x16x16xf32, #tpu.memory_space<any>>) target(%arg1 : memref<2x4x16x16xf32, #tpu.memory_space<any>>) target_semaphore(%arg2 : memref<!tpu.dma_semaphore, #tpu.memory_space<semaphore_mem>>)
    tpu.wait_dma2 semaphore(%arg2 : memref<!tpu.dma_semaphore, #tpu.memory_space<semaphore_mem>>) src(%arg0 : memref<2x4x16x16xf32, #tpu.memory_space<any>>) dst(%arg1 : memref<2x4x16x16xf32, #tpu.memory_space<any>>)
    return
  }
}

</mosaic_0001>

<bundles_post_ra>
// kernel: noop_forward_copy.1
= control target key start
LH: loop header
LB: loop body
LE: loop exit
PB: predicated region body
PF: predicated region fallthrough
CT: control target
= control target key end

     0   :  { %s30_s6 = smov [#allocation2]   ;;  %s31_s7 = smov 131072   ;;  %s49_s0 = inlined_call_operand.hbm [shape: f32[2,4,16,16], index: 0, kind: input, shape index: {}]   ;;  %s50_s1 = inlined_call_operand.hbm [shape: f32[2,4,16,16], index: 1, kind: output, shape index: {}]  }
   0x1   :  { %s32_s8 = smov 0  }
   0x2   :  { %12 = dma.general %s49_s0, 2048, %s50_s1, %s30_s6, %s31_s7, [#allocation4], %s32_s8, 0  }
   0x3   :  { %28 = dma.done.wait [#allocation2], 2048 }
   0x4   :  { %29 = vsyncadd [#allocation2], 4294965248 }
   0x5   :  { %18 = vsyncmov [#allocation2] }
   0x8   :  { %s19_s13 = vpop.sfrf %18 }
   0x9   :  { %p24_p0 = scmp.ne.s32.totalorder %s19_s13, 0 }
   0xb   :  { %23 = shalt.err (%p24_p0)  }

</bundles_post_ra>
